<compile_context>
chip_gen: v5e
topology: v5e:2x2
jax: 0.10.0
libtpu: 0.0.40
codegen_flags: <defaults>
</compile_context>

<pallas_src>
import functools

import jax
import jax.numpy as jnp
from jax import lax
from jax.experimental import pallas as pl
from jax.experimental.pallas import tpu as pltpu


# ----------------------------------------------------------------------------
# Fused kernel: gcn_norm + num_layers GCNConv layers for a block of graphs.
# ref order: adjacency, node features, (W_l, b_l) * num_layers, output.
# ----------------------------------------------------------------------------
def _fused_gcn_kernel(*refs, num_layers, use_bf16_matmul):
    a_ref, x_ref = refs[0], refs[1]
    o_ref = refs[-1]
    wb_refs = refs[2:-1]

    mm_dtype = jnp.bfloat16 if use_bf16_matmul else jnp.float32

    # Upcast the (possibly bf16) adjacency once; all degree math stays f32.
    a_hat = a_ref[...].astype(jnp.float32)                     # (B, N, N)
    bblk, n, _ = a_hat.shape

    # add_remaining_self_loops(fill_value=1.0): only where the diagonal is 0.
    row = lax.broadcasted_iota(jnp.int32, (n, n), 0)
    col = lax.broadcasted_iota(jnp.int32, (n, n), 1)
    eye = (row == col)[None]                                   # (1, N, N)
    a_hat = jnp.where(jnp.logical_and(eye, a_hat == 0.0), 1.0, a_hat)

    # deg[b, i] = sum_r A_hat[b, r, i]  (column sums), needed in both layouts:
    #   lane-oriented (B,1,N) via a cheap XLU sublane reduce,
    #   sublane-oriented (B,N,1) via one mat-vec (once per block, not per layer).
    deg_lane = jnp.sum(a_hat, axis=1, keepdims=True)           # (B, 1, N)
    ones_col = jnp.ones((bblk, n, 1), jnp.float32)
    deg_sub = jnp.einsum('bri,brf->bif', a_hat, ones_col,
                         preferred_element_type=jnp.float32)   # (B, N, 1)
    dinv_lane = jnp.where(deg_lane > 0.0, lax.rsqrt(deg_lane), 0.0)
    dinv_sub = jnp.where(deg_sub > 0.0, lax.rsqrt(deg_sub), 0.0)

    # Pre-normalized propagation matrix; the only adjacency-sized tensor that
    # stays live through the layer loop (bf16 when use_bf16_matmul).
    n_prop = (dinv_sub * a_hat * dinv_lane).astype(mm_dtype)   # (B, N, N)

    x = x_ref[...].astype(jnp.float32)                         # (B, N, Fin)

    # out_l = N_prop^T @ (X_l @ W_l) + b_l ; ReLU between layers.
    for l in range(num_layers):
        w = wb_refs[2 * l][...]                 # (Fin_l, Fout_l), already mm_dtype
        bias = wb_refs[2 * l + 1][...]          # (1, Fout_l), f32
        fin, fout = w.shape

        # H = X @ W as one dense (B*N, Fin) @ (Fin, Fout) matmul (fills MXU M).
        h = jnp.dot(x.reshape(bblk * n, fin).astype(mm_dtype), w,
                    preferred_element_type=jnp.float32).reshape(bblk, n, fout)

        # agg[b, i, f] = sum_r N_prop[b, r, i] * h[b, r, f]
        # (transposed-LHS batched contraction; MXU handles it natively).
        x = jnp.einsum('bri,brf->bif', n_prop, h.astype(mm_dtype),
                       preferred_element_type=jnp.float32) + bias
        if l < num_layers - 1:
            x = jnp.maximum(x, 0.0)             # ReLU between layers

    o_ref[...] = x.astype(o_ref.dtype)


# ----------------------------------------------------------------------------
# Wrapper: one pallas_call over batch blocks.
# ----------------------------------------------------------------------------
def mygnn_gcn_forward(node_feature, adjacency_matrix, weights, biases, *,
                      use_bf16_matmul=True, batch_block=None,
                      adjacency_hbm_dtype=None):
    x = jnp.asarray(node_feature).astype(jnp.float32)
    if x.ndim == 2:
        x = x[None]
    a = jnp.asarray(adjacency_matrix)
    if a.ndim == 2:
        a = a[None]

    bz, n, fin = x.shape
    num_layers = len(weights)
    dims = [fin] + [int(w.shape[1]) for w in weights]
    fout = dims[-1]
    fmax = max(dims)

    # HBM dtype for the adjacency (the dominant HBM stream). bf16 halves its
    # bytes; exact for 0/1 adjacencies (degrees stay f32). Weighted graphs lose
    # per-edge bf16 precision -> pass adjacency_hbm_dtype=jnp.float32 if needed.
    if adjacency_hbm_dtype is None:
        adjacency_hbm_dtype = jnp.bfloat16 if use_bf16_matmul else jnp.float32
    a = a.astype(adjacency_hbm_dtype)

    # Pad N to a multiple of 8 so (B,N,F)<->(B*N,F) reshapes are free relayouts.
    # Padded nodes have zero rows/cols (they only get a self-loop) and are
    # sliced off the output, so real nodes are unaffected.
    n_pad = ((n + 7) // 8) * 8
    if n_pad != n:
        a = jnp.pad(a, ((0, 0), (0, n_pad - n), (0, n_pad - n)))
        x = jnp.pad(x, ((0, 0), (0, n_pad - n), (0, 0)))

    mm_dtype = jnp.bfloat16 if use_bf16_matmul else jnp.float32
    weights = [jnp.asarray(w).astype(mm_dtype) for w in weights]
    biases = [jnp.asarray(b).astype(jnp.float32).reshape(1, -1) for b in biases]

    adj_bytes = a.dtype.itemsize
    mm_bytes = 2 if use_bf16_matmul else 4
    param_bytes = (sum(int(w.size) * w.dtype.itemsize for w in weights)
                   + sum(int(b.size) * b.dtype.itemsize for b in biases))

    def vmem_estimate(bblk):
        bn = bblk * n_pad
        # Double-buffered pipeline blocks (inputs + output) + params.
        pipe = 2 * (bn * n_pad * adj_bytes + bn * fin * 4 + bn * fout * 4
                    + param_bytes)
        # In-kernel intermediates: a_hat(f32) + n_prop(f32 while building)
        # + n_prop(mm dtype) + feature-sized temporaries (x, h, h_mm).
        comp = bn * n_pad * (4 + 4 + mm_bytes) + bn * fmax * (4 + 4 + mm_bytes)
        return pipe + comp

    try:
        vmem_capacity = int(pltpu.get_tpu_info().vmem_capacity_bytes)
    except Exception:
        vmem_capacity = 64 * 2 ** 20     # conservative (v7x per-TensorCore)

    if batch_block is None:
        budget = int(0.6 * vmem_capacity)
        divisors = [d for d in range(1, bz + 1) if bz % d == 0]
        fit = [d for d in divisors
               if vmem_estimate(d) <= budget and (d * n_pad <= 1024 or d == 1)]
        if not fit:
            fit = [1]
        # Keep grid >= 2 when possible so v7x's two TensorCores both get work.
        pref = [d for d in fit if bz // d >= 2] or fit
        target_rows = 512                # fill the MXU M dim / amortize per-step cost
        batch_block = min(pref, key=lambda d: (abs(d * n_pad - target_rows), -d))
    assert bz % batch_block == 0, "batch_block must divide the batch size"
    grid = (bz // batch_block,)

    # VMEM limit from the explicit accounting, clamped to the chip capacity.
    vmem_limit = int(min(max(vmem_capacity - 2 * 2 ** 20, 16 * 2 ** 20),
                         max(32 * 2 ** 20, int(1.5 * vmem_estimate(batch_block)))))

    kernel = functools.partial(_fused_gcn_kernel, num_layers=num_layers,
                               use_bf16_matmul=use_bf16_matmul)

    in_specs = [
        pl.BlockSpec((batch_block, n_pad, n_pad), lambda i: (i, 0, 0)),
        pl.BlockSpec((batch_block, n_pad, fin), lambda i: (i, 0, 0)),
    ]
    args = [a, x]
    for w, b in zip(weights, biases):
        in_specs.append(pl.BlockSpec(w.shape, lambda i: (0, 0)))
        in_specs.append(pl.BlockSpec(b.shape, lambda i: (0, 0)))
        args.append(w)
        args.append(b)
    out_specs = pl.BlockSpec((batch_block, n_pad, fout), lambda i: (i, 0, 0))

    # Advisory cost estimate for XLA's scheduler.
    flops = 2 * bz * n_pad * n_pad                    # degree mat-vec
    for l in range(num_layers):
        flops += 2 * bz * (n_pad * dims[l] * dims[l + 1]
                           + n_pad * n_pad * dims[l + 1])
    bytes_accessed = (bz * n_pad * n_pad * adj_bytes
                      + 4 * bz * n_pad * (fin + fout) + param_bytes)
    cost = pl.CostEstimate(flops=flops, transcendentals=2 * bz * n_pad,
                           bytes_accessed=bytes_accessed)

    out = pl.pallas_call(
        kernel,
        out_shape=jax.ShapeDtypeStruct((bz, n_pad, fout), jnp.float32),
        grid=grid,
        in_specs=in_specs,
        out_specs=out_specs,
        compiler_params=pltpu.CompilerParams(
            dimension_semantics=("parallel",),
            vmem_limit_bytes=vmem_limit),
        cost_estimate=cost,
    )(*args)
    return out[:, :n, :] if n_pad != n else out


# ----------------------------------------------------------------------------
# MyGNN(gnn_type='gcn') wrapper
# ----------------------------------------------------------------------------
class MyGNNPallas:
    def __init__(self, in_channels, hidden_channels, num_layers, key,
                 use_bf16_matmul=True):
        self.in_channels = in_channels
        self.hidden_channels = hidden_channels
        self.num_layers = num_layers
        self.use_bf16_matmul = use_bf16_matmul
        dims = [in_channels] + [hidden_channels] * num_layers
        self.weights = []
        self.biases = []
        for l in range(num_layers):
            key, wk = jax.random.split(key)
            fan_in, fan_out = dims[l], dims[l + 1]
            limit = (6.0 / (fan_in + fan_out)) ** 0.5      # Glorot uniform
            w = jax.random.uniform(wk, (fan_in, fan_out), jnp.float32,
                                   -limit, limit)
            self.weights.append(w)
            self.biases.append(jnp.zeros((1, fan_out), jnp.float32))

    def __call__(self, node_feature, adjacency_matrix):
        return mygnn_gcn_forward(node_feature, adjacency_matrix,
                                 self.weights, self.biases,
                                 use_bf16_matmul=self.use_bf16_matmul)


# Pure-JAX reference of the same math (correctness check only).
def gcn_reference(node_feature, adjacency, weights, biases):
    x = node_feature.astype(jnp.float32)
    a = adjacency.astype(jnp.float32)
    _, n, _ = a.shape
    eye = jnp.eye(n, dtype=bool)[None]
    a_hat = jnp.where(jnp.logical_and(eye, a == 0.0), 1.0, a)
    deg = jnp.sum(a_hat, axis=1)                                  # column sums
    dinv = jnp.where(deg > 0.0, 1.0 / jnp.sqrt(deg), 0.0)
    nprop = dinv[:, :, None] * jnp.swapaxes(a_hat, 1, 2) * dinv[:, None, :]
    for l, (w, b) in enumerate(zip(weights, biases)):
        x = nprop @ (x @ w) + b
        if l < len(weights) - 1:
            x = jax.nn.relu(x)
    return x


if __name__ == "__main__":
    bz, num_nodes, in_channels, hidden_channels, num_layers = 2, 16, 8, 32, 3

    key = jax.random.PRNGKey(0)
    key, kx, ka, kp = jax.random.split(key, 4)

    node_feature = jax.random.normal(kx, (bz, num_nodes, in_channels),
                                     jnp.float32)
    # Random sparse-ish binary adjacency with zero diagonal.
    adj = (jax.random.uniform(ka, (bz, num_nodes, num_nodes)) < 0.3
           ).astype(jnp.float32)
    adj = adj * (1.0 - jnp.eye(num_nodes, dtype=jnp.float32)[None])

    model = MyGNNPallas(in_channels, hidden_channels, num_layers, kp)
    ref = gcn_reference(node_feature, adj, model.weights, model.biases)

    # f32 path: strict numerical check against the pure-JAX reference.
    out_f32 = jax.block_until_ready(
        mygnn_gcn_forward(node_feature, adj, model.weights, model.biases,
                          use_bf16_matmul=False))
    assert out_f32.shape == (bz, num_nodes, hidden_channels), out_f32.shape
    assert jnp.allclose(out_f32, ref, rtol=1e-4, atol=1e-4), \
        float(jnp.max(jnp.abs(out_f32 - ref)))

    # Default path: bf16 MXU inputs + bf16 adjacency in HBM, f32 accumulation.
    out = jax.block_until_ready(model(node_feature, adj))
    assert out.shape == (bz, num_nodes, hidden_channels), out.shape
    assert jnp.allclose(out, ref, rtol=1e-1, atol=1e-1), \
        float(jnp.max(jnp.abs(out - ref)))

    print("KERNEL_OK")
</pallas_src>

<mosaic_0001>
module attributes {stable_mosaic.version = 11 : i64} {
  func.func @_fused_gcn_kernel(%arg0: i32, %arg1: memref<1x16x16xf32, #tpu.memory_space<vmem>>, %arg2: memref<1x16x8xf32, #tpu.memory_space<vmem>>, %arg3: memref<8x32xf32, #tpu.memory_space<vmem>>, %arg4: memref<1x32xf32, #tpu.memory_space<vmem>>, %arg5: memref<32x32xf32, #tpu.memory_space<vmem>>, %arg6: memref<1x32xf32, #tpu.memory_space<vmem>>, %arg7: memref<32x32xf32, #tpu.memory_space<vmem>>, %arg8: memref<1x32xf32, #tpu.memory_space<vmem>>, %arg9: memref<1x16x32xf32, #tpu.memory_space<vmem>>) attributes {dimension_semantics = [#tpu.dimension_semantics<parallel>], iteration_bounds = array<i64: 2>, scalar_prefetch = 0 : i64, scratch_operands = 0 : i64, tpu.core_type = #tpu.core_type<tc>, window_params = [{transform_indices = @transform_0, window_bounds = array<i64: 1, 16, 16>}, {transform_indices = @transform_1, window_bounds = array<i64: 1, 16, 8>}, {pipeline_mode = #tpu.pipeline_mode<synchronous>, transform_indices = @transform_2, window_bounds = array<i64: 8, 32>}, {pipeline_mode = #tpu.pipeline_mode<synchronous>, transform_indices = @transform_3, window_bounds = array<i64: 1, 32>}, {pipeline_mode = #tpu.pipeline_mode<synchronous>, transform_indices = @transform_4, window_bounds = array<i64: 32, 32>}, {pipeline_mode = #tpu.pipeline_mode<synchronous>, transform_indices = @transform_5, window_bounds = array<i64: 1, 32>}, {pipeline_mode = #tpu.pipeline_mode<synchronous>, transform_indices = @transform_6, window_bounds = array<i64: 32, 32>}, {pipeline_mode = #tpu.pipeline_mode<synchronous>, transform_indices = @transform_7, window_bounds = array<i64: 1, 32>}, {transform_indices = @transform_8, window_bounds = array<i64: 1, 16, 32>}]} {
    %c0 = arith.constant 0 : index
    %c0_0 = arith.constant 0 : index
    %c0_1 = arith.constant 0 : index
    %0 = vector.load %arg1[%c0, %c0_0, %c0_1] : memref<1x16x16xf32, #tpu.memory_space<vmem>>, vector<1x16x16xf32>
    %1 = tpu.iota {dimensions = array<i32: 0>} : vector<16x16xi32>
    %2 = tpu.iota {dimensions = array<i32: 1>} : vector<16x16xi32>
    %3 = arith.cmpi eq, %1, %2 : vector<16x16xi32>
    %4 = vector.shape_cast %3 : vector<16x16xi1> to vector<1x16x16xi1>
    %cst = arith.constant 0.000000e+00 : f32
    %5 = vector.broadcast %cst : f32 to vector<1x16x16xf32>
    %6 = arith.cmpf oeq, %0, %5 : vector<1x16x16xf32>
    %7 = arith.andi %4, %6 : vector<1x16x16xi1>
    %cst_2 = arith.constant 1.000000e+00 : f32
    %8 = vector.broadcast %cst_2 : f32 to vector<1x16x16xf32>
    %9 = arith.select %7, %8, %0 : vector<1x16x16xi1>, vector<1x16x16xf32>
    %cst_3 = arith.constant dense<0.000000e+00> : vector<1x16xf32>
    %10 = vector.multi_reduction <add>, %9, %cst_3 [1] : vector<1x16x16xf32> to vector<1x16xf32>
    %11 = vector.shape_cast %10 : vector<1x16xf32> to vector<1x1x16xf32>
    %cst_4 = arith.constant 1.000000e+00 : f32
    %12 = vector.broadcast %cst_4 : f32 to vector<1x16x1xf32>
    "tpu.trace_start"() <{level = 10 : i32, message = "bri,brf->bif"}> : () -> ()
    %cst_5 = arith.constant dense<0.000000e+00> : vector<1x16x1xf32>
    %13 = tpu.matmul %9, %12, %cst_5 {dimension_numbers = #tpu.dot_dimension_numbers<[1], [1], [2], [2], [0, 0, 0, 2, 1, 2], [0], [0]>} : vector<1x16x16xf32>, vector<1x16x1xf32>, vector<1x16x1xf32> -> vector<1x16x1xf32>
    %cst_6 = arith.constant 0.000000e+00 : f32
    "tpu.trace_stop"() : () -> ()
    %14 = vector.broadcast %cst_6 : f32 to vector<1x1x16xf32>
    %15 = arith.cmpf ogt, %11, %14 : vector<1x1x16xf32>
    %16 = math.rsqrt %11 : vector<1x1x16xf32>
    %cst_7 = arith.constant 0.000000e+00 : f32
    %17 = vector.broadcast %cst_7 : f32 to vector<1x1x16xf32>
    %18 = arith.select %15, %16, %17 : vector<1x1x16xi1>, vector<1x1x16xf32>
    %cst_8 = arith.constant 0.000000e+00 : f32
    %19 = vector.broadcast %cst_8 : f32 to vector<1x16x1xf32>
    %20 = arith.cmpf ogt, %13, %19 : vector<1x16x1xf32>
    %21 = math.rsqrt %13 : vector<1x16x1xf32>
    %cst_9 = arith.constant 0.000000e+00 : f32
    %22 = vector.broadcast %cst_9 : f32 to vector<1x16x1xf32>
    %23 = arith.select %20, %21, %22 : vector<1x16x1xi1>, vector<1x16x1xf32>
    %24 = vector.broadcast %23 : vector<1x16x1xf32> to vector<1x16x16xf32>
    %25 = arith.mulf %24, %9 : vector<1x16x16xf32>
    %26 = vector.broadcast %18 : vector<1x1x16xf32> to vector<1x16x16xf32>
    %27 = arith.mulf %25, %26 : vector<1x16x16xf32>
    %c0_10 = arith.constant 0 : index
    %c0_11 = arith.constant 0 : index
    %c0_12 = arith.constant 0 : index
    %28 = vector.load %arg2[%c0_10, %c0_11, %c0_12] : memref<1x16x8xf32, #tpu.memory_space<vmem>>, vector<1x16x8xf32>
    %c0_13 = arith.constant 0 : index
    %c0_14 = arith.constant 0 : index
    %29 = vector.load %arg3[%c0_13, %c0_14] : memref<8x32xf32, #tpu.memory_space<vmem>>, vector<8x32xf32>
    %c0_15 = arith.constant 0 : index
    %c0_16 = arith.constant 0 : index
    %30 = vector.load %arg4[%c0_15, %c0_16] : memref<1x32xf32, #tpu.memory_space<vmem>>, vector<1x32xf32>
    %31 = vector.shape_cast %28 : vector<1x16x8xf32> to vector<16x8xf32>
    %cst_17 = arith.constant dense<0.000000e+00> : vector<16x32xf32>
    %32 = tpu.matmul %31, %29, %cst_17 {dimension_numbers = #tpu.dot_dimension_numbers<[1], [0], [0], [1], [0, 0, 1, 1], [], []>} : vector<16x8xf32>, vector<8x32xf32>, vector<16x32xf32> -> vector<16x32xf32>
    %33 = vector.shape_cast %32 : vector<16x32xf32> to vector<1x16x32xf32>
    "tpu.trace_start"() <{level = 10 : i32, message = "bri,brf->bif"}> : () -> ()
    %cst_18 = arith.constant dense<0.000000e+00> : vector<1x16x32xf32>
    %34 = tpu.matmul %27, %33, %cst_18 {dimension_numbers = #tpu.dot_dimension_numbers<[1], [1], [2], [2], [0, 0, 0, 2, 1, 2], [0], [0]>} : vector<1x16x16xf32>, vector<1x16x32xf32>, vector<1x16x32xf32> -> vector<1x16x32xf32>
    "tpu.trace_stop"() : () -> ()
    %35 = vector.shape_cast %30 : vector<1x32xf32> to vector<1x1x32xf32>
    %36 = vector.broadcast %35 : vector<1x1x32xf32> to vector<1x16x32xf32>
    %37 = arith.addf %34, %36 : vector<1x16x32xf32>
    %cst_19 = arith.constant 0.000000e+00 : f32
    %38 = vector.broadcast %cst_19 : f32 to vector<1x16x32xf32>
    %39 = arith.maximumf %37, %38 : vector<1x16x32xf32>
    %c0_20 = arith.constant 0 : index
    %c0_21 = arith.constant 0 : index
    %40 = vector.load %arg5[%c0_20, %c0_21] : memref<32x32xf32, #tpu.memory_space<vmem>>, vector<32x32xf32>
    %c0_22 = arith.constant 0 : index
    %c0_23 = arith.constant 0 : index
    %41 = vector.load %arg6[%c0_22, %c0_23] : memref<1x32xf32, #tpu.memory_space<vmem>>, vector<1x32xf32>
    %42 = vector.shape_cast %39 : vector<1x16x32xf32> to vector<16x32xf32>
    %cst_24 = arith.constant dense<0.000000e+00> : vector<16x32xf32>
    %43 = tpu.matmul %42, %40, %cst_24 {dimension_numbers = #tpu.dot_dimension_numbers<[1], [0], [0], [1], [0, 0, 1, 1], [], []>} : vector<16x32xf32>, vector<32x32xf32>, vector<16x32xf32> -> vector<16x32xf32>
    %44 = vector.shape_cast %43 : vector<16x32xf32> to vector<1x16x32xf32>
    "tpu.trace_start"() <{level = 10 : i32, message = "bri,brf->bif"}> : () -> ()
    %cst_25 = arith.constant dense<0.000000e+00> : vector<1x16x32xf32>
    %45 = tpu.matmul %27, %44, %cst_25 {dimension_numbers = #tpu.dot_dimension_numbers<[1], [1], [2], [2], [0, 0, 0, 2, 1, 2], [0], [0]>} : vector<1x16x16xf32>, vector<1x16x32xf32>, vector<1x16x32xf32> -> vector<1x16x32xf32>
    "tpu.trace_stop"() : () -> ()
    %46 = vector.shape_cast %41 : vector<1x32xf32> to vector<1x1x32xf32>
    %47 = vector.broadcast %46 : vector<1x1x32xf32> to vector<1x16x32xf32>
    %48 = arith.addf %45, %47 : vector<1x16x32xf32>
    %cst_26 = arith.constant 0.000000e+00 : f32
    %49 = vector.broadcast %cst_26 : f32 to vector<1x16x32xf32>
    %50 = arith.maximumf %48, %49 : vector<1x16x32xf32>
    %c0_27 = arith.constant 0 : index
    %c0_28 = arith.constant 0 : index
    %51 = vector.load %arg7[%c0_27, %c0_28] : memref<32x32xf32, #tpu.memory_space<vmem>>, vector<32x32xf32>
    %c0_29 = arith.constant 0 : index
    %c0_30 = arith.constant 0 : index
    %52 = vector.load %arg8[%c0_29, %c0_30] : memref<1x32xf32, #tpu.memory_space<vmem>>, vector<1x32xf32>
    %53 = vector.shape_cast %50 : vector<1x16x32xf32> to vector<16x32xf32>
    %cst_31 = arith.constant dense<0.000000e+00> : vector<16x32xf32>
    %54 = tpu.matmul %53, %51, %cst_31 {dimension_numbers = #tpu.dot_dimension_numbers<[1], [0], [0], [1], [0, 0, 1, 1], [], []>} : vector<16x32xf32>, vector<32x32xf32>, vector<16x32xf32> -> vector<16x32xf32>
    %55 = vector.shape_cast %54 : vector<16x32xf32> to vector<1x16x32xf32>
    "tpu.trace_start"() <{level = 10 : i32, message = "bri,brf->bif"}> : () -> ()
    %cst_32 = arith.constant dense<0.000000e+00> : vector<1x16x32xf32>
    %56 = tpu.matmul %27, %55, %cst_32 {dimension_numbers = #tpu.dot_dimension_numbers<[1], [1], [2], [2], [0, 0, 0, 2, 1, 2], [0], [0]>} : vector<1x16x16xf32>, vector<1x16x32xf32>, vector<1x16x32xf32> -> vector<1x16x32xf32>
    "tpu.trace_stop"() : () -> ()
    %57 = vector.shape_cast %52 : vector<1x32xf32> to vector<1x1x32xf32>
    %58 = vector.broadcast %57 : vector<1x1x32xf32> to vector<1x16x32xf32>
    %59 = arith.addf %56, %58 : vector<1x16x32xf32>
    %c0_33 = arith.constant 0 : index
    %c0_34 = arith.constant 0 : index
    %c0_35 = arith.constant 0 : index
    %60 = vector.load %arg9[%c0_33, %c0_34, %c0_35] : memref<1x16x32xf32, #tpu.memory_space<vmem>>, vector<1x16x32xf32>
    tpu.vector_store %arg9[%c0_33, %c0_34, %c0_35], %59 {strides = array<i32>} : memref<1x16x32xf32, #tpu.memory_space<vmem>>, vector<1x16x32xf32>,
    return
  }
  func.func @transform_0(%arg0: i32) -> (i32, i32, i32) {
    %c0_i32 = arith.constant 0 : i32
    %c0_i32_0 = arith.constant 0 : i32
    %c0_i32_1 = arith.constant 0 : i32
    return %arg0, %c0_i32, %c0_i32_0 : i32, i32, i32
  }
  func.func @transform_1(%arg0: i32) -> (i32, i32, i32) {
    %c0_i32 = arith.constant 0 : i32
    %c0_i32_0 = arith.constant 0 : i32
    %c0_i32_1 = arith.constant 0 : i32
    return %arg0, %c0_i32, %c0_i32_0 : i32, i32, i32
  }
  func.func @transform_2(%arg0: i32) -> (i32, i32) {
    %c0_i32 = arith.constant 0 : i32
    %c0_i32_0 = arith.constant 0 : i32
    %c0_i32_1 = arith.constant 0 : i32
    return %c0_i32, %c0_i32_0 : i32, i32
  }
  func.func @transform_3(%arg0: i32) -> (i32, i32) {
    %c0_i32 = arith.constant 0 : i32
    %c0_i32_0 = arith.constant 0 : i32
    %c0_i32_1 = arith.constant 0 : i32
    return %c0_i32, %c0_i32_0 : i32, i32
  }
  func.func @transform_4(%arg0: i32) -> (i32, i32) {
    %c0_i32 = arith.constant 0 : i32
    %c0_i32_0 = arith.constant 0 : i32
    %c0_i32_1 = arith.constant 0 : i32
    return %c0_i32, %c0_i32_0 : i32, i32
  }
  func.func @transform_5(%arg0: i32) -> (i32, i32) {
    %c0_i32 = arith.constant 0 : i32
    %c0_i32_0 = arith.constant 0 : i32
    %c0_i32_1 = arith.constant 0 : i32
    return %c0_i32, %c0_i32_0 : i32, i32
  }
  func.func @transform_6(%arg0: i32) -> (i32, i32) {
    %c0_i32 = arith.constant 0 : i32
    %c0_i32_0 = arith.constant 0 : i32
    %c0_i32_1 = arith.constant 0 : i32
    return %c0_i32, %c0_i32_0 : i32, i32
  }
  func.func @transform_7(%arg0: i32) -> (i32, i32) {
    %c0_i32 = arith.constant 0 : i32
    %c0_i32_0 = arith.constant 0 : i32
    %c0_i32_1 = arith.constant 0 : i32
    return %c0_i32, %c0_i32_0 : i32, i32
  }
  func.func @transform_8(%arg0: i32) -> (i32, i32, i32) {
    %c0_i32 = arith.constant 0 : i32
    %c0_i32_0 = arith.constant 0 : i32
    %c0_i32_1 = arith.constant 0 : i32
    return %arg0, %c0_i32, %c0_i32_0 : i32, i32, i32
  }
}

</mosaic_0001>

<bundles_post_ra>
// kernel: tpu_custom_call.1
= control target key start
LH: loop header
LB: loop body
LE: loop exit
PB: predicated region body
PF: predicated region fallthrough
CT: control target
= control target key end

     0   :  { %13 = vsyncpa [#allocation3], 0  ;;  %s1289_s0 = inlined_call_operand.vmem [shape: f32[2,16,16], index: 0, kind: input, shape index: {}]   ;;  %s1290_s1 = inlined_call_operand.vmem [shape: f32[2,16,8], index: 1, kind: input, shape index: {}]   ;;  %s1291_s2 = inlined_call_operand.vmem [shape: f32[8,32], index: 2, kind: input, shape index: {}]   ;;  %s1292_s3 = inlined_call_operand.vmem [shape: f32[1,32], index: 3, kind: input, shape index: {}]   ;;  %s1293_s4 = inlined_call_operand.hbm [shape: f32[32,32], index: 4, kind: input, shape index: {}]   ;;  %s1294_s5 = inlined_call_operand.vmem [shape: f32[1,32], index: 5, kind: input, shape index: {}]   ;;  %s1295_s6 = inlined_call_operand.hbm [shape: f32[32,32], index: 6, kind: input, shape index: {}]   ;;  %s1296_s7 = inlined_call_operand.vmem [shape: f32[1,32], index: 7, kind: input, shape index: {}]   ;;  %s1297_s8 = inlined_call_operand.hbm [shape: f32[2,16,32], index: 8, kind: output, shape index: {}]  }
   0x1   :  { %14 = vsyncpa [#allocation6], 0 }
   0x2   :  { %15 = vsyncpa [#allocation4], 0 }
   0x3   :  { %17 = vsyncpa [#allocation4 + $0x1], 0  ;;  %s1131_s27 = smov 0   ;;  %s1133_s28 = smov 0  }
   0x4   :  { %s1135_s29 = smov 0   ;;  %s1137_s30 = smov 0  }
   0x5 LB: > { %s1152_s9 = sadd.s32 4294967295, %s1076_s30   ;;  %s831_s10 = sadd.s32 4294967294, %s1076_s30   ;;  %s1076_s30 = sphi %s1137_s30, %s1304_s30   ;;  %s1072_s29 = sphi %s1135_s29, %s1303_s29   ;;  %s1068_s28 = sphi %s1133_s28, %s1302_s28   ;;  %s1064_s27 = sphi %s1131_s27, %s1301_s27  }
   0x6   : > { %s1156_s11 = sadd.s32 1, %s1076_s30   ;;  %s208_s12 = sadd.s32 1, %s1072_s29 }
   0x7   : > { %s205_s13 = ssub.s32 %s1076_s30, %s1156_s11  ;;  %p218_p0 = scmp.ne.s32.totalorder %s1072_s29, %s1068_s28 }
   0x8   : > { %p206_p1 = scmp.eq.s32.totalorder %s205_s13, 0  ;;  %p219_p2 = scmp.eq.s32.totalorder %s1152_s9, 1 }
   0x9   : > { %p224_p3 = scmp.ne.s32.totalorder %s1068_s28, %s1064_s27  ;;  %p225_p4 = scmp.eq.s32.totalorder %s831_s10, 1 }
   0xa   : > { %s1167_s14 = scalar_select %p206_p1, %s1072_s29, %s208_s12  }
   0xb   : > { %p1169_p5 = por %p219_p2, %p218_p0  ;;  %p1173_p6 = por %p225_p4, %p224_p3 }
   0xc   : > { %p832_p7 = scmp.ge.s32.totalorder %s1076_s30, 1  ;;  %p232_p8 = scmp.lt.s32.totalorder %s1076_s30, 3 }
   0xd   : > { %p889_p9 = scmp.eq.s32.totalorder %s1152_s9, 0  ;;  %s249_s20 = sshll.u32 %s1293_s4, 4  ;;  %s250_s20 = int_to_ptr.hbm [resolvable:$true] %s249_s20 }
   0xe   : > { %p1180_p10 = pnand %p832_p7, %p232_p8  ;;  %s1078_s21 = smov [#allocation2]  }
   0xf   : > { %s251_s22 = sshll.u32 %s1078_s21, 4  ;;  %s266_s25 = sshll.u32 %s1295_s6, 4  ;;  %s252_s22 = int_to_ptr.vmem [resolvable:$true] %s251_s22  ;;  %s267_s25 = int_to_ptr.hbm [resolvable:$true] %s266_s25 }
  0x10   : > { %p878_p11 = pneg %p1180_p10  ;;  %s1079_s26 = smov 128  }
  0x11   : > { %s1080_s10 = smov 8   ;;  %s1081_s12 = smov [#allocation5]  }
  0x12   : > { %p879_p12 = pnand %p889_p9, %p878_p11  ;;  %s268_s13 = sshll.u32 %s1081_s12, 4  ;;  %s269_s13 = int_to_ptr.vmem [resolvable:$true] %s268_s13 }
  0x13   : > { %303 = sbr.rel (%p1180_p10) target bundleno = 1318 (0x526), region = 52 }
  0x14   : > { %881 = dma.hbm_to_vmem [thread:$0]  (!%p879_p12), %s250_s20, 512, %s252_s22, [#allocation3], %s1079_s26, %s1079_s26, %s1080_s10  }
  0x15   : > { %884 = dma.hbm_to_vmem [thread:$0]  (!%p879_p12), %s267_s25, 512, %s269_s13, [#allocation6], %s1079_s26, %s1079_s26, %s1080_s10  }
  0x18   : > { %1051 = dma.done.wait (%p889_p9), [#allocation3], 512  }
  0x19   : > { %1053 = vsyncadd (%p889_p9), [#allocation3], 4294966784 }
  0x1a   : > { %1055 = dma.done.wait (%p889_p9), [#allocation6], 512  }
  0x1b   : > { %1057 = vsyncadd (%p889_p9), [#allocation6], 4294966784  ;;  %p348_p13 = scmp.lt.s32.totalorder %s1152_s9, 1  ;;  %v360_v0 = vlaneseq  ;;  %v1082_v1 = vmov 1.0   ;;  %vm373_vm6 = vcmask 130048   ;;  %v1083_v11 = vmov 0  }
  0x1c   : > { %435 = vmatpush.msra.mxu0 %v1082_v1  ;;  %866 = vmatpush.msra.mxu3 %v1082_v1  ;;  %v496_v42 = vld [vmem:[%s1291_s2] sm:$0xff]  ;;  %vm498_vm15 = vcmask 64512   ;;  %v597_v58 = vld [vmem:[#allocation2 + $0x18] sm:$0xff]  ;;  %v596_v61 = vld [vmem:[#allocation2 + $0x10] sm:$0xff]  ;;  %s865_s22 = sshll.u32 %s1152_s9, 4 }
  0x1d   : > { %s1206_s17 = scalar_select %p348_p13, %s1152_s9, 1  ;;  %v361_v2 = vshrl.u32 %v360_v0, 7  ;;  %v364_v3 = vand.u32 127, %v360_v0  ;;  %935 = vset.pattern.permute.xlu1 %v1083_v11  ;;  %520 = vmatpush.msra.mxu1 %v496_v42  ;;  %v595_v62 = vld [vmem:[#allocation2 + $0x8] sm:$0xff]  ;;  %v594_v63 = vld [vmem:[#allocation2] sm:$0xff] }
  0x1e   : > { %436 = vmatpush.msra.mxu0 %v1082_v1  ;;  %867 = vmatpush.msra.mxu3 %v1082_v1  ;;  %v937_v0 = vld [vmem:[%s1292_s3] ss:$0 sm:$0xff]  ;;  %s731_s25 = scalar_lea.hbm %s1297_s8, %s865_s22 }
  0x1f   : > { %s863_s18 = sshll.u32 %s1206_s17, 4  ;;  %vm365_vm0 = vcmp.eq.s32.totalorder %v361_v2, %v364_v3  ;;  %v362_v4 = vadd.s32 8, %v361_v2  ;;  %s734_s12 = sshll.u32 %s731_s25, 4  ;;  %s735_s12 = int_to_ptr.hbm [resolvable:$true] %s734_s12 }
  0x20   : > { %s352_s21 = scalar_lea.vmem %s1289_s0, %s863_s18  ;;  %s357_s24 = scalar_lea.vmem %s1290_s1, %s863_s18  ;;  %618 = vmatpush.msrb.mxu3 %v597_v58 }
  0x21   : > { %v358_v5 = vld [vmem:[%s352_s21] sm:$0xff]  ;;  %v359_v6 = vld [vmem:[%s352_s21 + $0x8] sm:$0xff]  ;;  %vm366_vm3 = vcmp.eq.s32.totalorder %v362_v4, %v364_v3  ;;  %s345_s18 = sand.u32 1, %s1068_s28   ;;  %s1020_s9 = sshra.s32 %s735_s12, 4  ;;  %s1021_s9 = int_to_ptr.hbm [resolvable:$true] %s1020_s9 }
  0x22   : > { %vm367_vm1 = vcmp.eq.f32.partialorder %v358_v5, 0.0  ;;  %vm368_vm4 = vcmp.eq.f32.partialorder %v359_v6, 0.0  ;;  %v494_v43 = vld [vmem:[%s357_s24] sm:$0xff]  ;;  %v495_v46 = vld [vmem:[%s357_s24 + $0x8] sm:$0xff]  ;;  %619 = vmatpush.msrb.mxu3 %v596_v61  ;;  %s839_s19 = sshll.u32 %s345_s18, 4  ;;  %s720_s13 = scalar_lea.sflag [#allocation4], %s345_s18 }
  0x23   : > { %vm369_vm2 = vmand %vm365_vm0, %vm367_vm1  ;;  %846 = vmatmul.msk.f32.vlgmr.msra.gmra.mxu1 %vm498_vm15, %v494_v43  ;;  %s347_s26 = scalar_lea.vmem [#allocation7], %s839_s19  ;;  %s1022_s17 = scalar_lea.hbm %s1021_s9, 16 }
  0x24   : > { %v1214_v7 = vsel %vm369_vm2, 1.0, %v358_v5  ;;  %vm370_vm5 = vmand %vm366_vm3, %vm368_vm4  ;;  %620 = vmatpush.msrb.mxu3 %v595_v62  ;;  %vm599_vm4 = vcmask 261120   ;;  %s732_s10 = sshll.u32 %s347_s26, 4  ;;  %p1023_p0 = scmp.ne.s32.totalorder %s1021_s9, %s1022_s17  ;;  %s733_s10 = int_to_ptr.vmem [resolvable:$true] %s732_s10 }
  0x25   : > { %383 = vxpose.xlu0.b32.start [1/2] (short) (narrow) %v1214_v7, 16  ;;  %v1217_v8 = vsel %vm370_vm5, 1.0, %v359_v6  ;;  %v374_v30 = vsel %vm373_vm6, %v1214_v7, 0.0  ;;  %s1026_s21 = scalar_lea.hbm %s1297_s8, 32  ;;  %p1027_p3 = scmp.lt.s32.totalorder %s1021_s9, %s1297_s8 }
  0x26   : > { %v375_v31 = vsel %vm373_vm6, %v1217_v8, 0.0  ;;  %621 = vmatpush.msrb.mxu3 %v594_v63  ;;  %p1024_p1 = pnand %p1023_p0, %p1169_p5  ;;  %p1028_p4 = scmp.lt.s32.totalorder %s1026_s21, %s1022_s17 }
  0x27   : > { %v376_v32 = vadd.f32 %v375_v31, %v374_v30 }
  0x28   : > { %p1025_p2 = pneg %p1024_p1  ;;  %p1029_p7 = por %p1028_p4, %p1027_p3 }
  0x29   : > { %v377_v33 = vrot.slane %v376_v32, 4 }
  0x2a   : > { %p1030_p8 = pnand %p1029_p7, %p1025_p2 }
  0x2b   : > { %v378_v34 = vadd.f32 %v377_v33, %v376_v32  ;;  %847 = vmatmul.msk.f32.gmra.mxu1 %vm498_vm15, %v495_v46 }
  0x2d   : > { %384 = vxpose.xlu0.b32.end [2/2] (short) (narrow) %v1217_v8, 16  ;;  %v379_v35 = vrot.slane %v378_v34, 2 }
  0x2f   : > { %v380_v36 = vadd.f32 %v379_v35, %v378_v34 }
  0x31   : > { %v381_v37 = vrot.slane %v380_v36, 1 }
  0x33   : > { %v382_v38 = vadd.f32 %v381_v37, %v380_v36 }
  0x35   : > { %vm451_vm0 = vweird.f32 %v382_v38  ;;  %vm444_vm3 = vcmp.gt.f32.partialorder %v382_v38, 0.0 }
  0x94   : > { %936 = vset.pattern.permute.xlu0 %v1083_v11  ;;  %v658_v11 = vld [vmem:[#allocation5 + $0x8] sm:$0xff] }
  0xa0   : > { %v522_v56 = vpop.f32.mrf.mxu1 }
  0xa8   : > { %v525_v57 = vpop.f32.mrf.mxu1 }
  0xa9   : > { %583 = vmatpush.msra.mxu2 %v525_v57 }
  0xab   : > { %584 = vmatpush.msra.mxu2 %v522_v56 }
  0xc9   : > { %v399_v9 = vpop.trf.xlu0 }
  0xca   : > { %844 = vmatmul.msk.f32.vlgmr.msra.gmra.mxu0 %vm373_vm6, %v399_v9 }
  0xd1   : > { %v400_v10 = vpop.trf.xlu0 }
  0xd2   : > { %845 = vmatmul.msk.f32.vlgmr.msra.gmra.mxu3 %vm373_vm6, %v400_v10  ;;  %v659_v10 = vld [vmem:[#allocation5 + $0x10] sm:$0xff] }
 0x147   : > { %v438_v12 = vpop.f32.mrf.mxu0 }
 0x148   : > { %940 = vrsqrt.f32 %v438_v12  ;;  %vm464_vm8 = vweird.f32 %v438_v12  ;;  %vm456_vm10 = vcmp.gt.f32.partialorder %v438_v12, 0.0 }
 0x14e   : > { %v941_v13 = vpop.eup %940 }
 0x14f   : > { %v459_v14 = vmul.f32 %v941_v13, %v438_v12  ;;  %vm465_vm7 = vweird.f32 %v941_v13  ;;  %v657_v12 = vld [vmem:[#allocation5] sm:$0xff] }
 0x150   : > { %vm466_vm9 = vmor %vm464_vm8, %vm465_vm7 }
 0x151   : > { %v460_v15 = vmul.f32 %v941_v13, %v459_v14 }
 0x153   : > { %v461_v16 = vmul.f32 0.5, %v460_v15 }
 0x155   : > { %v441_v17 = vpop.f32.mrf.mxu3  ;;  %v462_v18 = vsub.f32 1.5, %v461_v16 }
 0x156   : > { %942 = vrsqrt.f32 %v441_v17  ;;  %vm474_vm12 = vweird.f32 %v441_v17  ;;  %vm457_vm14 = vcmp.gt.f32.partialorder %v441_v17, 0.0 }
 0x157   : > { %v463_v19 = vmul.f32 %v941_v13, %v462_v18  ;;  %944 = vrsqrt.f32 %v382_v38 }
 0x159   : > { %v467_v20 = vsel %vm466_vm9, %v941_v13, %v463_v19  ;;  %v938_v13 = vld [vmem:[%s1294_s5] ss:$0 sm:$0xff] }
 0x15a   : > { %v478_v21 = vsel %vm456_vm10, %v467_v20, 0.0 }
 0x15b   : > { %482 = vperm.xlu1 %935, %v478_v21  }
 0x15c   : > { %v943_v22 = vpop.eup %942 }
 0x15d   : > { %v469_v23 = vmul.f32 %v943_v22, %v441_v17  ;;  %vm475_vm11 = vweird.f32 %v943_v22  ;;  %v945_v39 = vpop.eup %944 }
 0x15e   : > { %vm476_vm13 = vmor %vm474_vm12, %vm475_vm11  ;;  %v446_v40 = vmul.f32 %v945_v39, %v382_v38  ;;  %vm452_vm1 = vweird.f32 %v945_v39 }
 0x15f   : > { %v470_v24 = vmul.f32 %v943_v22, %v469_v23  ;;  %vm453_vm2 = vmor %vm451_vm0, %vm452_vm1 }
 0x160   : > { %v447_v41 = vmul.f32 %v945_v39, %v446_v40 }
 0x161   : > { %v471_v25 = vmul.f32 0.5, %v470_v24 }
 0x162   : > { %v448_v44 = vmul.f32 0.5, %v447_v41 }
 0x163   : > { %v472_v26 = vsub.f32 1.5, %v471_v25 }
 0x164   : > { %v449_v45 = vsub.f32 1.5, %v448_v44 }
 0x165   : > { %v473_v27 = vmul.f32 %v943_v22, %v472_v26 }
 0x166   : > { %v450_v47 = vmul.f32 %v945_v39, %v449_v45 }
 0x167   : > { %v477_v28 = vsel %vm476_vm13, %v943_v22, %v473_v27  ;;  %v939_v22 = vld [vmem:[%s1296_s7] ss:$0 sm:$0xff] }
 0x168   : > { %v479_v29 = vsel %vm457_vm14, %v477_v28, 0.0  ;;  %v454_v48 = vsel %vm453_vm2, %v945_v39, %v450_v47 }
 0x169   : > { %487 = vperm.xlu1 %935, %v479_v29   ;;  %v455_v50 = vsel %vm444_vm3, %v454_v48, 0.0 }
 0x1cd   : > { %v483_v49 = vpop.permute.xlu1 %482 }
 0x1ce   : > { %v490_v51 = vmul.f32 %v483_v49, %v1214_v7  ;;  %v660_v7 = vld [vmem:[#allocation5 + $0x18] sm:$0xff] }
 0x1cf   : > { %680 = vmatpush.msrb.mxu0 %v660_v7 }
 0x1d0   : > { %v492_v52 = vmul.f32 %v490_v51, %v455_v50 }
 0x1d1   : > { %681 = vmatpush.msrb.mxu0 %v659_v10 }
 0x1d2   : > { %531 = vxpose.xlu2.b32.start [1/2] (short) (narrow) %v492_v52, 16 }
 0x1d3   : > { %682 = vmatpush.msrb.mxu0 %v658_v11 }
 0x1d5   : > { %683 = vmatpush.msrb.mxu0 %v657_v12 }
 0x1db   : > { %v488_v53 = vpop.permute.xlu1 %487 }
 0x1dc   : > { %v491_v54 = vmul.f32 %v488_v53, %v1217_v8 }
 0x1de   : > { %v493_v55 = vmul.f32 %v491_v54, %v455_v50 }
 0x1e0   : > { %532 = vxpose.xlu2.b32.end [2/2] (short) (narrow) %v493_v55, 16 }
 0x271   : > { %v547_v59 = vpop.trf.xlu2 }
 0x272   : > { %848 = vmatmul.msk.f32.vlgmr.msra.gmra.mxu2 %vm373_vm6, %v547_v59 }
 0x279   : > { %v548_v60 = vpop.trf.xlu2 }
 0x27a   : > { %849 = vmatmul.msk.f32.gmra.mxu2 %vm373_vm6, %v548_v60 }
 0x2f5   : > { %v586_v1 = vpop.f32.mrf.mxu2 }
 0x2f6   : > { %v587_v2 = vadd.f32 %v937_v0, %v586_v1 }
 0x2f8   : > { %v592_v3 = vmax.f32 %v587_v2, 0.0 }
 0x2fa   : > { %850 = vmatmul.msk.f32.vlgmr.msrb.gmra.mxu3 %vm599_vm4, %v592_v3 }
 0x2fd   : > { %v589_v4 = vpop.f32.mrf.mxu2 }
 0x2fe   : > { %v590_v5 = vadd.f32 %v937_v0, %v589_v4 }
 0x300   : > { %v593_v6 = vmax.f32 %v590_v5, 0.0 }
 0x302   : > { %851 = vmatmul.msk.f32.gmra.mxu3 %vm599_vm4, %v593_v6 }
 0x37d   : > { %v623_v8 = vpop.f32.mrf.mxu3 }
 0x385   : > { %v626_v9 = vpop.f32.mrf.mxu3 }
 0x386   : > { %646 = vmatpush.msrb.mxu1 %v626_v9 }
 0x388   : > { %647 = vmatpush.msrb.mxu1 %v623_v8 }
 0x389   : > { %852 = vmatmul.msk.f32.vlgmr.msrb.gmra.mxu1 %vm373_vm6, %v547_v59 }
 0x391   : > { %853 = vmatmul.msk.f32.gmra.mxu1 %vm373_vm6, %v548_v60 }
 0x406   : > { %v649_v14 = vpop.f32.mrf.mxu1 }
 0x407   : > { %v650_v15 = vadd.f32 %v938_v13, %v649_v14 }
 0x409   : > { %v655_v16 = vmax.f32 %v650_v15, 0.0 }
 0x40b   : > { %854 = vmatmul.msk.f32.vlgmr.msrb.gmra.mxu0 %vm599_vm4, %v655_v16 }
 0x40e   : > { %v652_v17 = vpop.f32.mrf.mxu1 }
 0x40f   : > { %v653_v18 = vadd.f32 %v938_v13, %v652_v17 }
 0x411   : > { %v656_v19 = vmax.f32 %v653_v18, 0.0 }
 0x413   : > { %855 = vmatmul.msk.f32.gmra.mxu0 %vm599_vm4, %v656_v19 }
 0x488   : > { %v685_v20 = vpop.f32.mrf.mxu0 }
 0x490   : > { %v688_v21 = vpop.f32.mrf.mxu0 }
 0x491   : > { %708 = vmatpush.msrb.mxu2 %v688_v21 }
 0x493   : > { %709 = vmatpush.msrb.mxu2 %v685_v20 }
 0x494   : > { %856 = vmatmul.msk.f32.vlgmr.msrb.gmra.mxu2 %vm373_vm6, %v547_v59 }
 0x49c   : > { %857 = vmatmul.msk.f32.gmra.mxu2 %vm373_vm6, %v548_v60 }
 0x517   : > { %v711_v23 = vpop.f32.mrf.mxu2 }
 0x518   : > { %v712_v24 = vadd.f32 %v939_v22, %v711_v23 }
 0x51a   : > { %717 = vst.msk [vmem:[%s347_s26] sm:$0xff] %vm599_vm4, %v712_v24 }
 0x51f   : > { %v714_v25 = vpop.f32.mrf.mxu2 }
 0x520   : > { %v715_v26 = vadd.f32 %v939_v22, %v714_v25 }
 0x522   : > { %718 = vst.msk [vmem:[%s347_s26 + $0x8] sm:$0xff] %vm599_vm4, %v715_v26 }
 0x523   : > { %1033 = shalt.err (!%p1030_p8)
}
 0x524   : > { %s1084_s18 = smov 128   ;;  %s1085_s24 = smov 8  }
 0x525   : > { %876 = dma.vmem_to_hbm [thread:$0]  (%p1169_p5), %s733_s10, 256, %s735_s12, %s720_s13, %s1084_s18, %s1084_s18, %s1085_s24  }
 0x526 PF: > { %p893_p9 = scmp.ge.s32.totalorder %s1076_s30, 2  ;;  %s749_s25 = sand.u32 1, %s1064_s27  }
 0x527   : > { %s750_s26 = scalar_lea.sflag [#allocation4], %s749_s25 }
 0x528   : > { %p886_p10 = pnand %p893_p9, %p1173_p6 }
 0x52a   : > { %p887_p11 = pneg %p886_p10 }
 0x52c   : > { %1059 = dma.done.wait (%p887_p11), %s750_s26, 256  }
 0x52d   : > { %1061 = vsyncadd (%p887_p11), %s750_s26, 4294967040  ;;  %p20_p12 = scmp.ge.s32.totalorder %s1156_s11, 4   ;;  %s1301_s27 = smov %s1068_s28 }
 0x52e   : > { %s1302_s28 = smov %s1072_s29  ;;  %s1303_s29 = smov %s1167_s14 }
 0x52f   : > { %s1304_s30 = smov %s1156_s11  ;;  %22 = sbr.rel (!%p20_p12) target bundleno = 5 (0x5), region = 99 }
 0x534   :  { %756 = vsyncpa [#allocation3], 1 }
 0x535   :  { %758 = vsyncpa [#allocation3 + $0x1], 1 }
 0x536   :  { %759 = vsyncpa [#allocation6], 1 }
 0x537   :  { %760 = vsyncpa [#allocation4], 1 }
 0x538   :  { %762 = vsyncpa [#allocation4 + $0x1], 1 }

</bundles_post_ra>
